<compile_context>
chip_gen: v6e
topology: v6e:2x2x1
jax: 0.10.0
libtpu: 0.0.40
codegen_flags: <defaults>
</compile_context>

<pallas_src>
import jax
import jax.numpy as jnp
from jax import lax
from jax.experimental import pallas as pl
from jax.experimental.pallas import tpu as pltpu


def _round_up(v, m):
    return ((v + m - 1) // m) * m


def _cdiv(a, b):
    return (a + b - 1) // b


def _fit_tile(dim, max_tile, align):
    """Smallest `align`-multiple tile covering `dim` in ceil(dim/max_tile) pieces.

    Minimizes padding waste vs. blindly using max_tile."""
    n_tiles = max(1, _cdiv(dim, max_tile))
    return _round_up(_cdiv(dim, n_tiles), align)


def _default_tiles(x_dtype):
    """Per-generation (block_m, block_n, block_k) defaults from the HBM/MXU roofline."""
    try:
        kind = jax.devices()[0].device_kind.lower()
    except Exception:
        kind = ""
    if "v5" in kind:
        block_m = 256                       # ~240 FLOPs/byte knee: 256 is already enough.
    elif "v6" in kind:
        block_m = 1024 if x_dtype.itemsize <= 2 else 512   # needs ~650 FLOPs/byte.
    else:
        block_m = 512                       # v7x (~310 FLOPs/byte) / unknown; 64 MiB VMEM.
    return block_m, 256, 2048


def _l2cls_kernel(x_ref, w_ref, inv_ref, b_ref, o_ref, acc_ref):
    # Grid = (B tiles, C tiles, F tiles); F (contraction) innermost.
    k = pl.program_id(2)

    @pl.when(k == 0)
    def _():
        acc_ref[...] = jnp.zeros_like(acc_ref)

    # (bm, bk) . (bn, bk)^T -> (bm, bn); operands in native dtype, f32 accumulation.
    acc_ref[...] += lax.dot_general(
        x_ref[...], w_ref[...],
        dimension_numbers=(((1,), (1,)), ((), ())),
        preferred_element_type=jnp.float32)

    @pl.when(k == pl.num_programs(2) - 1)
    def _():
        out = acc_ref[...] * inv_ref[...] + b_ref[...].astype(jnp.float32)
        o_ref[...] = out.astype(o_ref.dtype)


def l2cls_forward(x, weight, bias, *, block_m=None, block_n=None, block_k=None):
    """x: (B, F); weight: (C, F) as in nn.Linear; bias: (C,). Returns (B, C)."""
    B, F = x.shape
    C = weight.shape[0]

    dbm, dbn, dbk = _default_tiles(x.dtype)
    block_m = block_m or dbm
    block_n = block_n or dbn
    block_k = block_k or dbk

    # Row-tile sublane granularity follows x's packing (8 f32, 16 bf16, 32 int8/fp8).
    sublane = max(8, 32 // max(1, x.dtype.itemsize))

    bm = _fit_tile(B, block_m, sublane)
    bn = _fit_tile(C, block_n, 128)
    bk = _fit_tile(F, block_k, 128)

    Bp = _round_up(B, bm)
    Cp = _round_up(C, bn)
    Fp = _round_up(F, bk)

    # Zero padding: padded x rows/cols and W rows are zero, so padded outputs are
    # bias-or-zero and get sliced off below.
    xp = x if (Bp, Fp) == (B, F) else jnp.pad(x, ((0, Bp - B), (0, Fp - F)))
    wp = weight if (Cp, Fp) == (C, F) else jnp.pad(weight, ((0, Cp - C), (0, Fp - F)))
    bp = (bias if Cp == C else jnp.pad(bias, (0, Cp - C))).reshape(1, Cp)

    # Hoisted per-row 1/||x||: O(B*F) work, negligible vs. the O(B*C*F) matmul.
    xf = xp.astype(jnp.float32)
    sq = jnp.sum(xf * xf, axis=1, keepdims=True)
    # F.normalize: x / max(||x||, 1e-12)  ==  x * rsqrt(max(sq, 1e-24))
    inv_norm = lax.rsqrt(jnp.maximum(sq, 1e-24))            # (Bp, 1) f32

    grid = (Bp // bm, Cp // bn, Fp // bk)

    # Explicit VMEM budget: double-buffered inputs/outputs + f32 accumulator,
    # with 25% headroom; clamp to [32 MiB, 64 MiB] so it's never below the
    # scoped defaults and never above v7x's physical VMEM.
    vmem_needed = (
        2 * bm * bk * xp.dtype.itemsize +        # x tiles
        2 * bn * bk * wp.dtype.itemsize +        # weight tiles
        2 * bm * 4 +                             # inv_norm tiles
        2 * bn * bp.dtype.itemsize +             # bias tiles
        2 * bm * bn * x.dtype.itemsize +         # output tiles
        bm * bn * 4)                             # accumulator scratch
    vmem_limit = min(max(int(vmem_needed * 1.25), 32 * 1024 * 1024),
                     64 * 1024 * 1024)

    flops = 2 * Bp * Cp * Fp
    bytes_accessed = int(
        (Cp // bn) * Bp * Fp * xp.dtype.itemsize +   # x re-streamed per C tile
        (Bp // bm) * Cp * Fp * wp.dtype.itemsize +   # W re-streamed per B tile
        Bp * Cp * x.dtype.itemsize + Bp * 4 + Cp * bp.dtype.itemsize)

    out = pl.pallas_call(
        _l2cls_kernel,
        out_shape=jax.ShapeDtypeStruct((Bp, Cp), x.dtype),
        grid_spec=pltpu.PrefetchScalarGridSpec(
            num_scalar_prefetch=0,
            grid=grid,
            in_specs=[
                pl.BlockSpec((bm, bk), lambda i, j, k: (i, k)),   # x tile
                pl.BlockSpec((bn, bk), lambda i, j, k: (j, k)),   # W tile, (C, F) layout
                pl.BlockSpec((bm, 1), lambda i, j, k: (i, 0)),    # 1/||x|| tile
                pl.BlockSpec((1, bn), lambda i, j, k: (0, j)),    # bias tile
            ],
            out_specs=pl.BlockSpec((bm, bn), lambda i, j, k: (i, j)),
            scratch_shapes=[pltpu.VMEM((bm, bn), jnp.float32)],
        ),
        compiler_params=pltpu.CompilerParams(
            dimension_semantics=("parallel", "parallel", "arbitrary"),
            vmem_limit_bytes=vmem_limit),
        cost_estimate=pl.CostEstimate(
            flops=flops, transcendentals=0, bytes_accessed=bytes_accessed),
    )(xp, wp, inv_norm, bp)

    return out[:B, :C]


if __name__ == "__main__":
    # Small shapes consistent with the module: batch=8, feat_dim=32, class_num=16.
    B, FEAT, CLS = 8, 32, 16

    key = jax.random.PRNGKey(0)
    kx, kw, kb = jax.random.split(key, 3)

    x = jax.random.normal(kx, (B, FEAT), dtype=jnp.float32)

    # Deterministic nn.Linear-style init: uniform(-1/sqrt(feat), 1/sqrt(feat)).
    bound = 1.0 / jnp.sqrt(jnp.float32(FEAT))
    weight = jax.random.uniform(kw, (CLS, FEAT), minval=-bound, maxval=bound,
                                dtype=jnp.float32)
    bias = jax.random.uniform(kb, (CLS,), minval=-bound, maxval=bound,
                              dtype=jnp.float32)

    out = l2cls_forward(x, weight, bias)
    out = jax.block_until_ready(out)

    # Pure-JAX reference.
    norm = jnp.sqrt(jnp.sum(x * x, axis=1, keepdims=True))
    x_n = x / jnp.maximum(norm, 1e-12)
    ref = x_n @ weight.T + bias
    assert out.shape == (B, CLS)
    assert jnp.allclose(out, ref, atol=1e-5, rtol=1e-5)

    print("KERNEL_OK")
</pallas_src>

<mosaic_0001>
module attributes {stable_mosaic.version = 11 : i64} {
  func.func @_l2cls_kernel(%arg0: i32, %arg1: i32, %arg2: i32, %arg3: memref<8x128xf32, #tpu.memory_space<vmem>>, %arg4: memref<128x128xf32, #tpu.memory_space<vmem>>, %arg5: memref<8x1xf32, #tpu.memory_space<vmem>>, %arg6: memref<1x128xf32, #tpu.memory_space<vmem>>, %arg7: memref<8x128xf32, #tpu.memory_space<vmem>>, %arg8: memref<8x128xf32, #tpu.memory_space<vmem>>) attributes {dimension_semantics = [#tpu.dimension_semantics<parallel>, #tpu.dimension_semantics<parallel>, #tpu.dimension_semantics<arbitrary>], iteration_bounds = array<i64: 1, 1, 1>, scalar_prefetch = 0 : i64, scratch_operands = 1 : i64, tpu.core_type = #tpu.core_type<tc>, window_params = [{transform_indices = @transform_0, window_bounds = array<i64: 8, 128>}, {transform_indices = @transform_1, window_bounds = array<i64: 128, 128>}, {transform_indices = @transform_2, window_bounds = array<i64: 8, 1>}, {transform_indices = @transform_3, window_bounds = array<i64: 1, 128>}, {transform_indices = @transform_4, window_bounds = array<i64: 8, 128>}]} {
    %c0_i32 = arith.constant 0 : i32
    %0 = arith.cmpi eq, %arg2, %c0_i32 : i32
    %1 = arith.extui %0 : i1 to i32
    %c0_i32_0 = arith.constant 0 : i32
    %2 = arith.cmpi ne, %1, %c0_i32_0 : i32
    scf.if %2 {
      %cst_10 = arith.constant 0.000000e+00 : f32
      %12 = vector.broadcast %cst_10 : f32 to vector<8x128xf32>
      %c0_11 = arith.constant 0 : index
      %c0_12 = arith.constant 0 : index
      %13 = vector.load %arg8[%c0_11, %c0_12] : memref<8x128xf32, #tpu.memory_space<vmem>>, vector<8x128xf32>
      tpu.vector_store %arg8[%c0_11, %c0_12], %12 {strides = array<i32>} : memref<8x128xf32, #tpu.memory_space<vmem>>, vector<8x128xf32>,
    } else {
    }
    %c0 = arith.constant 0 : index
    %c0_1 = arith.constant 0 : index
    %3 = vector.load %arg8[%c0, %c0_1] : memref<8x128xf32, #tpu.memory_space<vmem>>, vector<8x128xf32>
    %c0_2 = arith.constant 0 : index
    %c0_3 = arith.constant 0 : index
    %4 = vector.load %arg3[%c0_2, %c0_3] : memref<8x128xf32, #tpu.memory_space<vmem>>, vector<8x128xf32>
    %c0_4 = arith.constant 0 : index
    %c0_5 = arith.constant 0 : index
    %5 = vector.load %arg4[%c0_4, %c0_5] : memref<128x128xf32, #tpu.memory_space<vmem>>, vector<128x128xf32>
    %cst = arith.constant dense<0.000000e+00> : vector<8x128xf32>
    %6 = tpu.matmul %4, %5, %cst {dimension_numbers = #tpu.dot_dimension_numbers<[1], [1], [0], [0], [0, 0, 1, 0], [], []>} : vector<8x128xf32>, vector<128x128xf32>, vector<8x128xf32> -> vector<8x128xf32>
    %7 = arith.addf %3, %6 : vector<8x128xf32>
    %c0_6 = arith.constant 0 : index
    %c0_7 = arith.constant 0 : index
    %8 = vector.load %arg8[%c0_6, %c0_7] : memref<8x128xf32, #tpu.memory_space<vmem>>, vector<8x128xf32>
    tpu.vector_store %arg8[%c0_6, %c0_7], %7 {strides = array<i32>} : memref<8x128xf32, #tpu.memory_space<vmem>>, vector<8x128xf32>,
    %c0_i32_8 = arith.constant 0 : i32
    %9 = arith.cmpi eq, %arg2, %c0_i32_8 : i32
    %10 = arith.extui %9 : i1 to i32
    %c0_i32_9 = arith.constant 0 : i32
    %11 = arith.cmpi ne, %10, %c0_i32_9 : i32
    scf.if %11 {
      %c0_10 = arith.constant 0 : index
      %c0_11 = arith.constant 0 : index
      %12 = vector.load %arg8[%c0_10, %c0_11] : memref<8x128xf32, #tpu.memory_space<vmem>>, vector<8x128xf32>
      %c0_12 = arith.constant 0 : index
      %c0_13 = arith.constant 0 : index
      %13 = vector.load %arg5[%c0_12, %c0_13] : memref<8x1xf32, #tpu.memory_space<vmem>>, vector<8x1xf32>
      %14 = vector.broadcast %13 : vector<8x1xf32> to vector<8x128xf32>
      %15 = arith.mulf %12, %14 : vector<8x128xf32>
      %c0_14 = arith.constant 0 : index
      %c0_15 = arith.constant 0 : index
      %16 = vector.load %arg6[%c0_14, %c0_15] : memref<1x128xf32, #tpu.memory_space<vmem>>, vector<1x128xf32>
      %17 = vector.broadcast %16 : vector<1x128xf32> to vector<8x128xf32>
      %18 = arith.addf %15, %17 : vector<8x128xf32>
      %c0_16 = arith.constant 0 : index
      %c0_17 = arith.constant 0 : index
      %19 = vector.load %arg7[%c0_16, %c0_17] : memref<8x128xf32, #tpu.memory_space<vmem>>, vector<8x128xf32>
      tpu.vector_store %arg7[%c0_16, %c0_17], %18 {strides = array<i32>} : memref<8x128xf32, #tpu.memory_space<vmem>>, vector<8x128xf32>,
    } else {
    }
    return
  }
  func.func @transform_0(%arg0: i32, %arg1: i32, %arg2: i32) -> (i32, i32) {
    %c0_i32 = arith.constant 0 : i32
    return %arg0, %arg2 : i32, i32
  }
  func.func @transform_1(%arg0: i32, %arg1: i32, %arg2: i32) -> (i32, i32) {
    %c0_i32 = arith.constant 0 : i32
    return %arg1, %arg2 : i32, i32
  }
  func.func @transform_2(%arg0: i32, %arg1: i32, %arg2: i32) -> (i32, i32) {
    %c0_i32 = arith.constant 0 : i32
    %c0_i32_0 = arith.constant 0 : i32
    return %arg0, %c0_i32 : i32, i32
  }
  func.func @transform_3(%arg0: i32, %arg1: i32, %arg2: i32) -> (i32, i32) {
    %c0_i32 = arith.constant 0 : i32
    %c0_i32_0 = arith.constant 0 : i32
    return %c0_i32, %arg1 : i32, i32
  }
  func.func @transform_4(%arg0: i32, %arg1: i32, %arg2: i32) -> (i32, i32) {
    %c0_i32 = arith.constant 0 : i32
    return %arg0, %arg1 : i32, i32
  }
}

</mosaic_0001>

<bundles_post_ra>
// kernel: tpu_custom_call.1
= control target key start
LH: loop header
LB: loop body
LE: loop exit
PB: predicated region body
PF: predicated region fallthrough
CT: control target
= control target key end

     0   :  { %9 = vsyncpa [#allocation4], 0  ;;  %s314_s0 = inlined_call_operand.vmem [shape: f32[8,128], index: 0, kind: input, shape index: {}]   ;;  %s315_s1 = inlined_call_operand.hbm [shape: f32[128,128], index: 1, kind: input, shape index: {}]   ;;  %s316_s2 = inlined_call_operand.vmem [shape: f32[8,1], index: 2, kind: input, shape index: {}]   ;;  %s317_s3 = inlined_call_operand.vmem [shape: f32[1,128], index: 3, kind: input, shape index: {}]   ;;  %s318_s4 = inlined_call_operand.hbm [shape: f32[8,128], index: 4, kind: output, shape index: {}]  }
   0x1   :  { %10 = vsyncpa [#allocation5], 0  ;;  %s267_s15 = smov [#allocation3]  }
   0x2   :  { %s18_s16 = sshll.u32 %s267_s15, 4  ;;  %s19_s16 = int_to_ptr.vmem [resolvable:$true] %s18_s16 }
   0x3   :  { %s231_s17 = scalar_lea.vmem %s19_s16, 2048  ;;  %p236_p1 = scmp.lt.s32.totalorder %s19_s16, %s19_s16 }
   0x4   :  { %p232_p0 = scmp.ne.s32.totalorder %s19_s16, %s231_s17  ;;  %p237_p2 = scmp.lt.s32.totalorder %s231_s17, %s231_s17 }
   0x6   :  { %p238_p3 = por %p237_p2, %p236_p1 }
   0x8   :  { %p239_p4 = pnand %p238_p3, %p232_p0 }
   0xa   :  { %242 = shalt.err (!%p239_p4)
}
   0xb   :  { %s268_s18 = smov 128   ;;  %s269_s19 = smov 8  }
   0xc   :  { %24 = dma.hbm_to_vmem [thread:$0]  %s315_s1, 2048, %s19_s16, [#allocation4], %s268_s18, %s268_s18, %s269_s19  }
   0xd   :  { %263 = dma.done.wait [#allocation4], 2048  }
   0xe   :  { %264 = vsyncadd [#allocation4], 4294965248  ;;  %v270_v0 = vmov 0.0   ;;  %vm271_vm0 = vmmov 0   ;;  %v272_v1 = vmov 0   ;;  %v54_v2 = vld [vmem:[#allocation3 + $0x78] sm:$0xff] }
   0xf   :  { %180 = vmatprep.subr.mxu0 %v270_v0  ;;  %212 = vmatprep.mubr.msk.f32.mxu0 %vm271_vm0, %v270_v0  ;;  %v53_v3 = vld [vmem:[#allocation3 + $0x70] sm:$0xff]  ;;  %v131_v4 = vld [vmem:[%s316_s2] sm:$0xff]  ;;  %v52_v5 = vld [vmem:[#allocation3 + $0x68] sm:$0xff]  ;;  %s273_s26 = smov [#allocation6]  }
  0x10   :  { %222 = vset.pattern.permute.xlu0 %v272_v1  ;;  %181 = vmatpush3.xpose.msra.mxu0 %v54_v2  ;;  %v51_v6 = vld [vmem:[#allocation3 + $0x60] sm:$0xff]  ;;  %v50_v7 = vld [vmem:[#allocation3 + $0x58] sm:$0xff]  ;;  %v49_v8 = vld [vmem:[#allocation3 + $0x50] sm:$0xff]  ;;  %s153_s27 = sshll.u32 %s273_s26, 4  ;;  %s154_s27 = int_to_ptr.vmem [resolvable:$true] %s153_s27 }
  0x11   :  { %182 = vmatprep.subr.mxu0 %v270_v0  ;;  %134 = vperm.xlu0 %222, %v131_v4   ;;  %v48_v9 = vld [vmem:[#allocation3 + $0x48] sm:$0xff]  ;;  %v47_v10 = vld [vmem:[#allocation3 + $0x40] sm:$0xff]  ;;  %v46_v11 = vld [vmem:[#allocation3 + $0x38] sm:$0xff]  ;;  %s243_s28 = scalar_lea.vmem %s154_s27, 128  ;;  %p248_p6 = scmp.lt.s32.totalorder %s154_s27, %s154_s27 }
  0x12   :  { %v45_v12 = vld [vmem:[#allocation3 + $0x30] sm:$0xff]  ;;  %v44_v13 = vld [vmem:[#allocation3 + $0x28] sm:$0xff]  ;;  %v43_v14 = vld [vmem:[#allocation3 + $0x20] sm:$0xff]  ;;  %p244_p5 = scmp.ne.s32.totalorder %s154_s27, %s243_s28  ;;  %p249_p7 = scmp.lt.s32.totalorder %s243_s28, %s243_s28 }
  0x13   :  { %v42_v15 = vld [vmem:[#allocation3 + $0x18] sm:$0xff]  ;;  %v41_v16 = vld [vmem:[#allocation3 + $0x10] sm:$0xff]  ;;  %v40_v17 = vld [vmem:[#allocation3 + $0x8] sm:$0xff] }
  0x14   :  { %183 = vmatpush3.xpose.msra.mxu0 %v53_v3  ;;  %v39_v18 = vld [vmem:[#allocation3] sm:$0xff]  ;;  %p250_p8 = por %p249_p7, %p248_p6 }
  0x15   :  { %184 = vmatprep.subr.mxu0 %v270_v0  ;;  %v38_v19 = vld [vmem:[%s314_s0] sm:$0xff] }
  0x16   :  { %v162_v22 = vld [vmem:[%s317_s3] ss:$0 sm:$0xff]  ;;  %p251_p9 = pnand %p250_p8, %p244_p5 }
  0x18   :  { %185 = vmatpush3.xpose.msra.mxu0 %v52_v5 }
  0x19   :  { %186 = vmatprep.subr.mxu0 %v270_v0 }
  0x1c   :  { %187 = vmatpush3.xpose.msra.mxu0 %v51_v6 }
  0x1d   :  { %188 = vmatprep.subr.mxu0 %v270_v0 }
  0x20   :  { %189 = vmatpush3.xpose.msra.mxu0 %v50_v7 }
  0x21   :  { %190 = vmatprep.subr.mxu0 %v270_v0 }
  0x24   :  { %191 = vmatpush3.xpose.msra.mxu0 %v49_v8 }
  0x25   :  { %192 = vmatprep.subr.mxu0 %v270_v0 }
  0x28   :  { %193 = vmatpush3.xpose.msra.mxu0 %v48_v9 }
  0x29   :  { %194 = vmatprep.subr.mxu0 %v270_v0 }
  0x2c   :  { %195 = vmatpush3.xpose.msra.mxu0 %v47_v10 }
  0x2d   :  { %196 = vmatprep.subr.mxu0 %v270_v0 }
  0x30   :  { %197 = vmatpush3.xpose.msra.mxu0 %v46_v11 }
  0x31   :  { %198 = vmatprep.subr.mxu0 %v270_v0 }
  0x34   :  { %199 = vmatpush3.xpose.msra.mxu0 %v45_v12 }
  0x35   :  { %200 = vmatprep.subr.mxu0 %v270_v0 }
  0x38   :  { %201 = vmatpush3.xpose.msra.mxu0 %v44_v13 }
  0x39   :  { %202 = vmatprep.subr.mxu0 %v270_v0 }
  0x3c   :  { %203 = vmatpush3.xpose.msra.mxu0 %v43_v14 }
  0x3d   :  { %204 = vmatprep.subr.mxu0 %v270_v0 }
  0x40   :  { %205 = vmatpush3.xpose.msra.mxu0 %v42_v15 }
  0x41   :  { %206 = vmatprep.subr.mxu0 %v270_v0 }
  0x44   :  { %207 = vmatpush3.xpose.msra.mxu0 %v41_v16 }
  0x45   :  { %208 = vmatprep.subr.mxu0 %v270_v0 }
  0x48   :  { %209 = vmatpush3.xpose.msra.mxu0 %v40_v17 }
  0x49   :  { %210 = vmatprep.subr.mxu0 %v270_v0 }
  0x4c   :  { %211 = vmatpush3.xpose.msra.mxu0 %v39_v18 }
  0x4f   :  { %213 = vmatmul.mubr.f32.vlgmr.msra.gmra.mxu0 %v38_v19 }
  0x8c   :  { %v135_v20 = vpop.permute.xlu0 %134 }
 0x10f   :  { %v121_v21 = vpop.f32.mrf.mxu0 }
 0x110   :  { %v137_v23 = vmul.f32 %v135_v20, %v121_v21 }
 0x111   :  { %v214_v24 = vpop.f32.mrf.mxu0 }
 0x112   :  { %v145_v25 = vadd.f32 %v162_v22, %v137_v23 }
 0x114   :  { %146 = vst [vmem:[#allocation6] sm:$0xff] %v145_v25 }
 0x115   :  { %254 = shalt.err (!%p251_p9)
}
 0x116   :  { %156 = dma.vmem_to_hbm [thread:$0]  %s154_s27, 128, %s318_s4, [#allocation5]  }
 0x117   :  { %265 = dma.done.wait [#allocation5], 128  }
 0x118   :  { %266 = vsyncadd [#allocation5], 4294967168 }
 0x119   :  { %160 = vsyncpa [#allocation4], 1 }
 0x11a   :  { %161 = vsyncpa [#allocation5], 1 }

</bundles_post_ra>
